<compile_context>
chip_gen: v7x
topology: tpu7x:2x2x1
jax: 0.10.0
libtpu: 0.0.40
codegen_flags: <defaults>
</compile_context>

<pallas_src>
import jax
import jax.numpy as jnp
from jax.experimental import pallas as pl
from jax.experimental.pallas import tpu as pltpu


# ------------------------------ sizing helpers -------------------------------

def _cdiv(a: int, b: int) -> int:
    return -(-a // b)


def _row_alignment(dtype) -> int:
    # Sub-32-bit dtypes pack along sublanes: f32 -> 8, bf16 -> 16, int8/fp8 -> 32.
    itemsize = jnp.dtype(dtype).itemsize
    return 8 * max(1, 4 // itemsize)


def _num_tensorcores() -> int:
    """Best-effort TensorCore count per chip (v5e/v6e: 1, v7x: 2)."""
    try:
        info = pltpu.get_tpu_info()
        for attr in ("num_cores", "core_count", "num_tensorcores", "tensorcore_count"):
            v = getattr(info, attr, None)
            if isinstance(v, int) and v > 0:
                return v
    except Exception:
        pass
    try:
        if "v7" in jax.devices()[0].device_kind.lower():
            return 2
    except Exception:
        pass
    return 1


def _vmem_limit_bytes() -> int:
    """Scoped VMEM limit = half the physical capacity, clamped to [32, 64] MiB."""
    try:
        cap = int(pltpu.get_tpu_info().vmem_capacity_bytes)
        return max(32 << 20, min(64 << 20, cap // 2))
    except Exception:
        return 32 << 20  # safe on every generation


def _compute_dtype(x_dtype):
    """bf16-native math on bf16-capable VPUs (v6e/v7x); f32 otherwise."""
    if jnp.dtype(x_dtype) == jnp.bfloat16:
        try:
            kind = jax.devices()[0].device_kind.lower()
        except Exception:
            return jnp.float32
        if "v5" in kind:  # v5e has no bf16 VALU
            return jnp.float32
        return jnp.bfloat16
    return jnp.float32


# ----------------------------- Pallas kernel --------------------------------

def _affine_kernel(scale_ref, bias_ref, x_ref, o_ref):
    """o = x * scale + bias on a (block_rows, block_cols) tile.

    scale/bias are block-tiled (block_rows, 1) stat columns that broadcast along
    the lane (column) axis; the body is a single VALU FMA per vreg.
    """
    s = scale_ref[...]                     # (block_rows, 1), compute dtype
    b = bias_ref[...]
    x = x_ref[...].astype(s.dtype)
    o_ref[...] = (x * s + b).astype(o_ref.dtype)


def _affine_2d(x2d, scale_col, bias_col):
    """Apply o = x*scale + bias row-wise; x2d is (rows, cols), stats are (rows, 1)."""
    rows, cols = x2d.shape
    itemsize = jnp.dtype(x2d.dtype).itemsize
    stats_itemsize = jnp.dtype(scale_col.dtype).itemsize
    row_align = _row_alignment(x2d.dtype)

    vmem_limit = _vmem_limit_bytes()
    # Single-buffered (in + out + 2 stat columns) tile budget; double-buffering
    # by the pipeline keeps total <= vmem_limit/2 with headroom.
    pair_budget = min(8 << 20, vmem_limit // 4)

    cols_padded = _cdiv(cols, 128) * 128           # lane-dense, unmasked stores
    rows_aligned = _cdiv(rows, row_align) * row_align
    stats_row_bytes = 2 * 128 * stats_itemsize     # two lane-padded stat cols / row

    # --- column (lane) tiling: only when a row_align-row full-width stripe
    #     exceeds the budget (very large H*W).
    per_row_full = 2 * cols_padded * itemsize + stats_row_bytes
    if row_align * per_row_full > pair_budget:
        avail = pair_budget // row_align - stats_row_bytes
        block_cols = max(128, (avail // (2 * itemsize)) // 128 * 128)
        block_cols = min(block_cols, cols_padded)
    else:
        block_cols = cols_padded
    num_col_blocks = _cdiv(cols_padded, block_cols)
    block_cols = _cdiv(_cdiv(cols_padded, num_col_blocks), 128) * 128
    cols_final = num_col_blocks * block_cols

    # --- row tiling: largest row tile whose (in+out+stats) footprint fits.
    per_row = 2 * block_cols * itemsize + stats_row_bytes
    max_block_rows = max(row_align, (pair_budget // per_row) // row_align * row_align)
    num_row_blocks = _cdiv(rows_aligned, max_block_rows)

    # Multi-core parts (v7x): want >= 2 grid steps per TensorCore so the loop
    # shards usefully and the prologue DMA is hidden. Single-TC chips keep a
    # single block when the data fits (avoids pure per-step overhead).
    ncores = _num_tensorcores()
    if ncores > 1:
        want_row_blocks = _cdiv(2 * ncores, num_col_blocks)
        num_row_blocks = max(num_row_blocks,
                             min(want_row_blocks, rows_aligned // row_align))

    block_rows = _cdiv(_cdiv(rows_aligned, num_row_blocks), row_align) * row_align
    num_row_blocks = _cdiv(rows_aligned, block_rows)
    rows_padded = num_row_blocks * block_rows

    if rows_padded != rows or cols_final != cols:
        x2d = jnp.pad(x2d, ((0, rows_padded - rows), (0, cols_final - cols)))
    if rows_padded != rows:
        scale_col = jnp.pad(scale_col, ((0, rows_padded - rows), (0, 0)))
        bias_col = jnp.pad(bias_col, ((0, rows_padded - rows), (0, 0)))

    out = pl.pallas_call(
        _affine_kernel,
        out_shape=jax.ShapeDtypeStruct((rows_padded, cols_final), x2d.dtype),
        grid_spec=pltpu.PrefetchScalarGridSpec(
            num_scalar_prefetch=0,
            grid=(num_row_blocks, num_col_blocks),
            in_specs=[
                # Block-tiled stat columns: tiny per-step DMA, no in-kernel slicing.
                pl.BlockSpec((block_rows, 1), lambda i, j: (i, 0)),
                pl.BlockSpec((block_rows, 1), lambda i, j: (i, 0)),
                # Data: lane-dense tile.
                pl.BlockSpec((block_rows, block_cols), lambda i, j: (i, j)),
            ],
            out_specs=pl.BlockSpec((block_rows, block_cols), lambda i, j: (i, j)),
        ),
        # Elementwise + identical in/out block maps -> safe to reuse x2d's buffer.
        input_output_aliases={2: 0},
        compiler_params=pltpu.CompilerParams(
            dimension_semantics=("parallel", "parallel"),
            vmem_limit_bytes=vmem_limit,
        ),
    )(scale_col, bias_col, x2d)

    if rows_padded != rows or cols_final != cols:
        out = out[:rows, :cols]
    return out


# --------------------------- Processor wrapper ------------------------------

class PallasStandardScalerProcessor:
    """Concrete Pallas implementation of the AbstractDataProcessor interface."""

    def __init__(self, num_channels: int):
        # Deterministic synthetic "parameters" (buffers in the PyTorch sense).
        c = jnp.arange(num_channels, dtype=jnp.float32)
        self.mean = 0.1 * c - 0.05          # (C,)
        self.std = 1.0 + 0.25 * c           # (C,), strictly positive
        self._model = lambda t: t           # identity until wrap() is called

    # ----- helpers -----
    def _flatten_affine(self, x, mode):
        n, c, h, w = x.shape
        mean = self.mean.astype(jnp.float32)
        std = self.std.astype(jnp.float32)
        if mode == "pre":
            scale = 1.0 / std               # reciprocal host-side -> FMA kernel
            bias = -mean * scale
        else:
            scale = std
            bias = mean
        cdt = _compute_dtype(x.dtype)
        scale_col = jnp.tile(scale, (n,)).reshape(n * c, 1).astype(cdt)
        bias_col = jnp.tile(bias, (n,)).reshape(n * c, 1).astype(cdt)
        return x.reshape(n * c, h * w), scale_col, bias_col, (n, c, h, w)

    # ----- AbstractDataProcessor interface -----
    def preprocess(self, x):
        x2d, s, b, shape = self._flatten_affine(x, "pre")
        return _affine_2d(x2d, s, b).reshape(shape)

    def postprocess(self, x):
        x2d, s, b, shape = self._flatten_affine(x, "post")
        return _affine_2d(x2d, s, b).reshape(shape)

    def wrap(self, model):
        self._model = model
        return self

    def forward(self, x):
        # TODO(synk): for end-to-end perf the pre/post affines should be fused
        # into the wrapped model's first/last Pallas kernels (removes two full
        # HBM round-trips); kept standalone here because the model is an
        # arbitrary opaque callable per the interface contract.
        return self.postprocess(self._model(self.preprocess(x)))

    def __call__(self, x):
        return self.forward(x)

    def to(self, device):
        self.mean = jax.device_put(self.mean, device)
        self.std = jax.device_put(self.std, device)
        return self


# --------------------------------- main -------------------------------------

if __name__ == "__main__":
    key = jax.random.PRNGKey(0)
    N, C, H, W = 2, 4, 16, 16
    x = jax.random.normal(key, (N, C, H, W), dtype=jnp.float32)

    proc = PallasStandardScalerProcessor(num_channels=C)
    proc = proc.wrap(lambda t: t)  # identity "model"

    # Pallas-backed forward pass.
    y = proc.forward(x)
    y = jax.block_until_ready(y)

    # Reference: identity model => postprocess(preprocess(x)) ~= x.
    mean_b = proc.mean.reshape(1, C, 1, 1)
    std_b = proc.std.reshape(1, C, 1, 1)
    pre_ref = (x - mean_b) / std_b
    post_ref = pre_ref * std_b + mean_b
    assert jnp.allclose(y, post_ref, atol=1e-5, rtol=1e-5)

    # preprocess alone vs reference.
    pre = jax.block_until_ready(proc.preprocess(x))
    assert jnp.allclose(pre, pre_ref, atol=1e-5, rtol=1e-5)

    print("KERNEL_OK")
</pallas_src>

<mosaic_0001>
module attributes {stable_mosaic.version = 11 : i64} {
  func.func @_affine_kernel(%arg0: i32, %arg1: i32, %arg2: memref<8x1xf32, #tpu.memory_space<vmem>>, %arg3: memref<8x1xf32, #tpu.memory_space<vmem>>, %arg4: memref<8x256xf32, #tpu.memory_space<vmem>>, %arg5: memref<8x256xf32, #tpu.memory_space<vmem>>) attributes {dimension_semantics = [#tpu.dimension_semantics<parallel>, #tpu.dimension_semantics<parallel>], iteration_bounds = array<i64: 1, 1>, scalar_prefetch = 0 : i64, scratch_operands = 0 : i64, tpu.core_type = #tpu.core_type<tc>, window_params = [{transform_indices = @transform_0, window_bounds = array<i64: 8, 1>}, {transform_indices = @transform_1, window_bounds = array<i64: 8, 1>}, {transform_indices = @transform_2, window_bounds = array<i64: 8, 256>}, {transform_indices = @transform_3, window_bounds = array<i64: 8, 256>}]} {
    %c0 = arith.constant 0 : index
    %c0_0 = arith.constant 0 : index
    %0 = vector.load %arg2[%c0, %c0_0] : memref<8x1xf32, #tpu.memory_space<vmem>>, vector<8x1xf32>
    %c0_1 = arith.constant 0 : index
    %c0_2 = arith.constant 0 : index
    %1 = vector.load %arg3[%c0_1, %c0_2] : memref<8x1xf32, #tpu.memory_space<vmem>>, vector<8x1xf32>
    %c0_3 = arith.constant 0 : index
    %c0_4 = arith.constant 0 : index
    %2 = vector.load %arg4[%c0_3, %c0_4] : memref<8x256xf32, #tpu.memory_space<vmem>>, vector<8x256xf32>
    %3 = vector.broadcast %0 : vector<8x1xf32> to vector<8x256xf32>
    %4 = arith.mulf %2, %3 : vector<8x256xf32>
    %5 = vector.broadcast %1 : vector<8x1xf32> to vector<8x256xf32>
    %6 = arith.addf %4, %5 : vector<8x256xf32>
    %c0_5 = arith.constant 0 : index
    %c0_6 = arith.constant 0 : index
    %7 = vector.load %arg5[%c0_5, %c0_6] : memref<8x256xf32, #tpu.memory_space<vmem>>, vector<8x256xf32>
    tpu.vector_store %arg5[%c0_5, %c0_6], %6 {strides = array<i32>} : memref<8x256xf32, #tpu.memory_space<vmem>>, vector<8x256xf32>,
    return
  }
  func.func @transform_0(%arg0: i32, %arg1: i32) -> (i32, i32) {
    %c0_i32 = arith.constant 0 : i32
    %c0_i32_0 = arith.constant 0 : i32
    return %arg0, %c0_i32 : i32, i32
  }
  func.func @transform_1(%arg0: i32, %arg1: i32) -> (i32, i32) {
    %c0_i32 = arith.constant 0 : i32
    %c0_i32_0 = arith.constant 0 : i32
    return %arg0, %c0_i32 : i32, i32
  }
  func.func @transform_2(%arg0: i32, %arg1: i32) -> (i32, i32) {
    %c0_i32 = arith.constant 0 : i32
    return %arg0, %arg1 : i32, i32
  }
  func.func @transform_3(%arg0: i32, %arg1: i32) -> (i32, i32) {
    %c0_i32 = arith.constant 0 : i32
    return %arg0, %arg1 : i32, i32
  }
}

</mosaic_0001>

<bundles_post_ra>
// kernel: tpu_custom_call.1
= control target key start
LH: loop header
LB: loop body
LE: loop exit
PB: predicated region body
PF: predicated region fallthrough
CT: control target
= control target key end

     0   :  { %8 = vsyncpa [#allocation3], 0  ;;  %s167_s0 = inlined_call_operand.vmem [shape: f32[8,1], index: 0, kind: input, shape index: {}]   ;;  %s168_s1 = inlined_call_operand.vmem [shape: f32[8,1], index: 1, kind: input, shape index: {}]   ;;  %s169_s2 = inlined_call_operand.hbm [shape: f32[8,256], index: 2, kind: input, shape index: {}, may-alias: {2,3}]   ;;  %s170_s3 = inlined_call_operand.hbm [shape: f32[8,256], index: 3, kind: output, shape index: {}, may-alias: {2,3}]  }
   0x1   :  { %9 = vsyncpa [#allocation4], 0  ;;  %s114_s12 = smov [#allocation2]   ;;  %s66_s16 = scalar_lea.hbm %s169_s2, 256 }
   0x2   :  { %s20_s13 = sshll.u32 %s114_s12, 4  ;;  %p67_p0 = scmp.ne.s32.totalorder %s169_s2, %s66_s16  ;;  %s21_s13 = int_to_ptr.vmem [resolvable:$true] %s20_s13 }
   0x3   :  { %p70_p1 = scmp.lt.u32.totalorder %s66_s16, %s169_s2 }
   0x5   :  { %p72_p2 = pnand %p70_p1, %p67_p0 }
   0x7   :  { %75 = shalt.err (!%p72_p2)
}
   0x8   :  { %s76_s21 = scalar_lea.vmem %s21_s13, 256  ;;  %p81_p4 = scmp.lt.s32.totalorder %s21_s13, %s21_s13 }
   0x9   :  { %p77_p3 = scmp.ne.s32.totalorder %s21_s13, %s76_s21  ;;  %p82_p5 = scmp.lt.s32.totalorder %s76_s21, %s76_s21 }
   0xb   :  { %p83_p6 = por %p82_p5, %p81_p4 }
   0xd   :  { %p84_p7 = pnand %p83_p6, %p77_p3 }
   0xf   :  { %87 = shalt.err (!%p84_p7)
}
  0x10   :  { %23 = dma.hbm_to_vmem [thread:$0]  %s169_s2, 256, %s21_s13, [#allocation3]  }
  0x11   :  { %110 = dma.done.wait [#allocation3], 256  }
  0x12   :  { %111 = vsyncadd [#allocation3], 4294967040  ;;  %v115_v0 = vmov 0   ;;  %v27_v1 = vld [vmem:[%s167_s0] sm:$0xff]  ;;  %v30_v4 = vld [vmem:[#allocation2 + $0x8] sm:$0xff]  ;;  %s116_s28 = smov [#allocation5]  }
  0x13   :  { %65 = vset.pattern.permute.xlu0 %v115_v0  ;;  %v28_v2 = vld [vmem:[%s168_s1] sm:$0xff]  ;;  %s53_s29 = sshll.u32 %s116_s28, 4  ;;  %s54_s29 = int_to_ptr.vmem [resolvable:$true] %s53_s29 }
  0x14   :  { %33 = vperm.xlu0 %65, %v27_v1   ;;  %v29_v3 = vld [vmem:[#allocation2] sm:$0xff]  ;;  %s88_s0 = scalar_lea.vmem %s54_s29, 256  ;;  %p93_p9 = scmp.lt.s32.totalorder %s54_s29, %s54_s29 }
  0x15   :  { %p89_p8 = scmp.ne.s32.totalorder %s54_s29, %s88_s0  ;;  %p94_p10 = scmp.lt.s32.totalorder %s88_s0, %s88_s0 }
  0x17   :  { %p95_p11 = por %p94_p10, %p93_p9 }
  0x18   :  { %40 = vperm.xlu0 %65, %v28_v2  }
  0x19   :  { %p96_p12 = pnand %p95_p11, %p89_p8 }
  0x93   :  { %v34_v5 = vpop.permute.xlu0 %33 }
  0x94   :  { %v36_v6 = vmul.f32 %v34_v5, %v29_v3  ;;  %v37_v7 = vmul.f32 %v34_v5, %v30_v4 }
  0x97   :  { %v41_v8 = vpop.permute.xlu0 %40 }
  0x98   :  { %v43_v9 = vadd.f32 %v41_v8, %v36_v6  ;;  %v44_v10 = vadd.f32 %v41_v8, %v37_v7 }
  0x9a   :  { %45 = vst [vmem:[#allocation5] sm:$0xff] %v43_v9  ;;  %46 = vst [vmem:[#allocation5 + $0x8] sm:$0xff] %v44_v10 }
  0x9b   :  { %99 = shalt.err (!%p96_p12)
}
  0x9c   :  { %s100_s30 = scalar_lea.hbm %s170_s3, 256 }
  0x9d   :  { %p101_p13 = scmp.ne.s32.totalorder %s170_s3, %s100_s30  ;;  %p104_p0 = scmp.lt.u32.totalorder %s100_s30, %s170_s3 }
  0x9f   :  { %p106_p1 = pnand %p104_p0, %p101_p13 }
  0xa1   :  { %109 = shalt.err (!%p106_p1)
}
  0xa2   :  { %56 = dma.vmem_to_hbm [thread:$0]  %s54_s29, 256, %s170_s3, [#allocation4]  }
  0xa3   :  { %112 = dma.done.wait [#allocation4], 256  }
  0xa4   :  { %113 = vsyncadd [#allocation4], 4294967040 }
  0xa5   :  { %60 = vsyncpa [#allocation3], 1 }
  0xa6   :  { %61 = vsyncpa [#allocation4], 1 }

</bundles_post_ra>
